<compile_context>
chip_gen: v5e
topology: v5e:2x2
jax: 0.10.0
libtpu: 0.0.40
codegen_flags: <defaults>
</compile_context>

<pallas_src>
import functools

import jax
import jax.numpy as jnp
from jax import lax
from jax.experimental import pallas as pl
from jax.experimental.pallas import tpu as pltpu


def _dense_layer_kernel(x_ref, w_ref, b_ref, o_ref, xpad_ref, patches_ref, *,
                        B, H, W, Cin, Cout, PAD):
    # x_ref       : (B, Cin, S)          input block, flattened spatial (lane-dense)
    # w_ref       : (Cout, 9*Cin)        fused conv weights, column = (ky*3+kx)*Cin + c
    # b_ref       : (Cout, 1)            bias (broadcasts over lanes)
    # o_ref       : (B, Cin+Cout, S)     concat([x, relu(conv(x)+b)]) channel-major
    # xpad_ref    : (Cin, S + 2*PAD)     zero-haloed flat image (VMEM scratch)
    # patches_ref : (9*Cin, S)           stacked im2col operand (VMEM scratch)
    S = H * W

    # Pass-through half of the concat, hoisted out of the per-image loop:
    # one lane-dense full-block store.
    o_ref[:, 0:Cin, :] = x_ref[...]

    # Horizontal-boundary lane masks, generated in-kernel (no HBM traffic).
    lane = lax.broadcasted_iota(jnp.int32, (Cin, S), 1)
    if (W & (W - 1)) == 0:          # power-of-two fast path (bitwise AND)
        col = lane & (W - 1)
    else:
        col = lane % W
    left_ok = col >= 1              # valid source for kx == 0 taps
    right_ok = col <= (W - 2)       # valid source for kx == 2 taps

    # Zero the halo once per grid step; the interior is overwritten per image.
    xpad_ref[...] = jnp.zeros_like(xpad_ref)

    w = w_ref[...]                  # (Cout, 9*Cin), resident
    bias = b_ref[...]               # (Cout, 1)

    # B is kept small (<= 4) by the wrapper, so a trace-time unrolled loop is fine.
    for b in range(B):
        xb = x_ref[b]                          # (Cin, S)
        xpad_ref[:, PAD:PAD + S] = xb          # place image inside the zero halo

        # Build the (9*Cin, S) im2col operand: one flat-offset slice per tap,
        # vertical boundaries come for free from the zero halo, horizontal
        # boundaries from the lane masks (row-wrap junk is exactly masked).
        for ky in range(3):
            for kx in range(3):
                t = ky * 3 + kx
                d = (ky - 1) * W + (kx - 1)
                patch = xpad_ref[:, PAD + d:PAD + d + S]      # (Cin, S)
                if kx == 0:
                    patch = jnp.where(left_ok, patch, 0.0)
                elif kx == 2:
                    patch = jnp.where(right_ok, patch, 0.0)
                patches_ref[t * Cin:(t + 1) * Cin, :] = patch

        # Single fused K = 9*Cin MXU matmul with f32 accumulation, then bias + ReLU.
        # (bf16 operands with f32 accumulation would be the v6e/v7x follow-up for
        #  compute-bound shapes; kept f32 here — the kernel is memory-bound.)
        acc = jnp.dot(w, patches_ref[...], preferred_element_type=jnp.float32)
        act = jnp.maximum(acc + bias, 0.0)
        o_ref[b, Cin:Cin + Cout, :] = act.astype(o_ref.dtype)


def _pick_images_per_step(n, cin, cout, s, itemsize=4, max_b=4,
                          vmem_budget_bytes=24 * 1024 * 1024, min_steps=2):
    """Images per grid step: amortize per-step overhead while keeping at least
    `min_steps` grid steps (megacore sharding on v7x + DMA/compute pipelining)
    and keeping the double-buffered in+out blocks within a VMEM budget."""
    per_image_bytes = (cin + (cin + cout)) * s * itemsize   # input + output block rows
    best = 1
    for b in range(1, min(n, max_b) + 1):
        if n % b != 0:
            continue
        if (n // b) < min(min_steps, n):
            continue
        if 2 * b * per_image_bytes <= vmem_budget_bytes:     # x2 for double buffering
            best = b
    return best


@jax.jit
def dense_layer(x_nchw, weight_oihw, bias):
    """Pallas DenseLayer.forward: cat([x, relu(conv3x3(x) + b)], channel dim).

    x_nchw:      (N, Cin, H, W)    float32
    weight_oihw: (Cout, Cin, 3, 3) float32 (PyTorch Conv2d layout)
    bias:        (Cout,)           float32
    returns:     (N, Cin + Cout, H, W)
    """
    N, Cin, H, W = x_nchw.shape
    Cout = weight_oihw.shape[0]
    S = H * W
    PAD = ((W + 1 + 127) // 128) * 128          # zero halo, >= max tap offset, lane-aligned

    B = _pick_images_per_step(N, Cin, Cout, S)

    # Free reshape (no HBM copy): flatten spatial dims.
    x_flat = x_nchw.reshape(N, Cin, S)
    # Fused weight slab: column index = (ky*3 + kx)*Cin + c, matching the patch stacking.
    w_fused = jnp.transpose(weight_oihw, (0, 2, 3, 1)).reshape(Cout, 9 * Cin)
    b_col = bias.reshape(Cout, 1)

    kernel = functools.partial(_dense_layer_kernel, B=B, H=H, W=W,
                               Cin=Cin, Cout=Cout, PAD=PAD)

    out_flat = pl.pallas_call(
        kernel,
        out_shape=jax.ShapeDtypeStruct((N, Cin + Cout, S), x_nchw.dtype),
        grid_spec=pltpu.PrefetchScalarGridSpec(
            num_scalar_prefetch=0,
            grid=(N // B,),
            in_specs=[
                pl.BlockSpec((B, Cin, S), lambda i: (i, 0, 0)),
                pl.BlockSpec((Cout, 9 * Cin), lambda i: (0, 0)),
                pl.BlockSpec((Cout, 1), lambda i: (0, 0)),
            ],
            out_specs=pl.BlockSpec((B, Cin + Cout, S), lambda i: (i, 0, 0)),
            scratch_shapes=[
                pltpu.VMEM((Cin, S + 2 * PAD), jnp.float32),   # zero-haloed image
                pltpu.VMEM((9 * Cin, S), jnp.float32),         # stacked im2col operand
            ],
        ),
        compiler_params=pltpu.CompilerParams(
            dimension_semantics=("parallel",),
            vmem_limit_bytes=32 * 1024 * 1024,
        ),
    )(x_flat, w_fused, b_col)

    # Free reshape back to NCHW (matches torch.cat((x, out), 1)).
    return out_flat.reshape(N, Cin + Cout, H, W)


if __name__ == "__main__":
    key = jax.random.PRNGKey(0)
    k_x, k_w, k_b = jax.random.split(key, 3)

    N, Cin, H, W = 2, 4, 16, 16
    growth_rate = 8  # Cout

    x = jax.random.normal(k_x, (N, Cin, H, W), dtype=jnp.float32)
    # Deterministic synthetic Conv2d(in_chs, growth_rate, 3, padding=1, bias=True) params.
    weight = jax.random.normal(k_w, (growth_rate, Cin, 3, 3), dtype=jnp.float32) * 0.1
    bias = jax.random.normal(k_b, (growth_rate,), dtype=jnp.float32) * 0.1

    out = jax.block_until_ready(dense_layer(x, weight, bias))

    # Pure-JAX reference to verify semantics.
    conv_ref = lax.conv_general_dilated(
        x, weight, window_strides=(1, 1), padding="SAME",
        dimension_numbers=("NCHW", "OIHW", "NCHW"))
    ref = jnp.concatenate(
        [x, jnp.maximum(conv_ref + bias[None, :, None, None], 0.0)], axis=1)

    assert out.shape == (N, Cin + growth_rate, H, W), out.shape
    max_err = float(jnp.max(jnp.abs(out - ref)))
    assert max_err < 1e-3, max_err
    print("KERNEL_OK")
</pallas_src>

<mosaic_0001>
module attributes {stable_mosaic.version = 11 : i64} {
  func.func @_dense_layer_kernel(%arg0: i32, %arg1: memref<1x4x256xf32, #tpu.memory_space<vmem>>, %arg2: memref<8x36xf32, #tpu.memory_space<vmem>>, %arg3: memref<8x1xf32, #tpu.memory_space<vmem>>, %arg4: memref<1x12x256xf32, #tpu.memory_space<vmem>>, %arg5: memref<4x512xf32, #tpu.memory_space<vmem>>, %arg6: memref<36x256xf32, #tpu.memory_space<vmem>>) attributes {dimension_semantics = [#tpu.dimension_semantics<parallel>], iteration_bounds = array<i64: 2>, scalar_prefetch = 0 : i64, scratch_operands = 2 : i64, tpu.core_type = #tpu.core_type<tc>, window_params = [{transform_indices = @transform_0, window_bounds = array<i64: 1, 4, 256>}, {pipeline_mode = #tpu.pipeline_mode<synchronous>, transform_indices = @transform_1, window_bounds = array<i64: 8, 36>}, {pipeline_mode = #tpu.pipeline_mode<synchronous>, transform_indices = @transform_2, window_bounds = array<i64: 8, 1>}, {transform_indices = @transform_3, window_bounds = array<i64: 1, 12, 256>}]} {
    %c0 = arith.constant 0 : index
    %c0_0 = arith.constant 0 : index
    %c0_1 = arith.constant 0 : index
    %0 = vector.load %arg1[%c0, %c0_0, %c0_1] : memref<1x4x256xf32, #tpu.memory_space<vmem>>, vector<1x4x256xf32>
    %c0_2 = arith.constant 0 : index
    %c0_3 = arith.constant 0 : index
    %c0_4 = arith.constant 0 : index
    %1 = vector.load %arg4[%c0_2, %c0_3, %c0_4] : memref<1x12x256xf32, #tpu.memory_space<vmem>>, vector<1x4x256xf32>
    tpu.vector_store %arg4[%c0_2, %c0_3, %c0_4], %0 {strides = array<i32>} : memref<1x12x256xf32, #tpu.memory_space<vmem>>, vector<1x4x256xf32>,
    %2 = tpu.iota {dimensions = array<i32: 1>} : vector<4x256xi32>
    %c15_i32 = arith.constant 15 : i32
    %3 = vector.broadcast %c15_i32 : i32 to vector<4x256xi32>
    %4 = arith.andi %2, %3 : vector<4x256xi32>
    %c1_i32 = arith.constant 1 : i32
    %5 = vector.broadcast %c1_i32 : i32 to vector<4x256xi32>
    %6 = arith.cmpi sge, %4, %5 : vector<4x256xi32>
    %c14_i32 = arith.constant 14 : i32
    %7 = vector.broadcast %c14_i32 : i32 to vector<4x256xi32>
    %8 = arith.cmpi sle, %4, %7 : vector<4x256xi32>
    %cst = arith.constant 0.000000e+00 : f32
    %9 = vector.broadcast %cst : f32 to vector<4x512xf32>
    %c0_5 = arith.constant 0 : index
    %c0_6 = arith.constant 0 : index
    %10 = vector.load %arg5[%c0_5, %c0_6] : memref<4x512xf32, #tpu.memory_space<vmem>>, vector<4x512xf32>
    tpu.vector_store %arg5[%c0_5, %c0_6], %9 {strides = array<i32>} : memref<4x512xf32, #tpu.memory_space<vmem>>, vector<4x512xf32>,
    %c0_7 = arith.constant 0 : index
    %c0_8 = arith.constant 0 : index
    %11 = vector.load %arg2[%c0_7, %c0_8] : memref<8x36xf32, #tpu.memory_space<vmem>>, vector<8x36xf32>
    %c0_9 = arith.constant 0 : index
    %c0_10 = arith.constant 0 : index
    %12 = vector.load %arg3[%c0_9, %c0_10] : memref<8x1xf32, #tpu.memory_space<vmem>>, vector<8x1xf32>
    %c0_11 = arith.constant 0 : index
    %c0_12 = arith.constant 0 : index
    %c0_13 = arith.constant 0 : index
    %13 = vector.load %arg1[%c0_11, %c0_12, %c0_13] : memref<1x4x256xf32, #tpu.memory_space<vmem>>, vector<1x4x256xf32>
    %14 = vector.shape_cast %13 : vector<1x4x256xf32> to vector<4x256xf32>
    %c0_14 = arith.constant 0 : index
    %c128 = arith.constant 128 : index
    %15 = vector.load %arg5[%c0_14, %c128] : memref<4x512xf32, #tpu.memory_space<vmem>>, vector<4x256xf32>
    tpu.vector_store %arg5[%c0_14, %c128], %14 {strides = array<i32>} : memref<4x512xf32, #tpu.memory_space<vmem>>, vector<4x256xf32>,
    %c0_15 = arith.constant 0 : index
    %c111 = arith.constant 111 : index
    %16 = vector.load %arg5[%c0_15, %c111] : memref<4x512xf32, #tpu.memory_space<vmem>>, vector<4x256xf32>
    %cst_16 = arith.constant 0.000000e+00 : f32
    %17 = vector.broadcast %cst_16 : f32 to vector<4x256xf32>
    %18 = arith.select %6, %16, %17 : vector<4x256xi1>, vector<4x256xf32>
    %c0_17 = arith.constant 0 : index
    %c0_18 = arith.constant 0 : index
    %19 = vector.load %arg6[%c0_17, %c0_18] : memref<36x256xf32, #tpu.memory_space<vmem>>, vector<4x256xf32>
    tpu.vector_store %arg6[%c0_17, %c0_18], %18 {strides = array<i32>} : memref<36x256xf32, #tpu.memory_space<vmem>>, vector<4x256xf32>,
    %c0_19 = arith.constant 0 : index
    %c112 = arith.constant 112 : index
    %20 = vector.load %arg5[%c0_19, %c112] : memref<4x512xf32, #tpu.memory_space<vmem>>, vector<4x256xf32>
    %c4 = arith.constant 4 : index
    %c0_20 = arith.constant 0 : index
    %21 = vector.load %arg6[%c4, %c0_20] : memref<36x256xf32, #tpu.memory_space<vmem>>, vector<4x256xf32>
    tpu.vector_store %arg6[%c4, %c0_20], %20 {strides = array<i32>} : memref<36x256xf32, #tpu.memory_space<vmem>>, vector<4x256xf32>,
    %c0_21 = arith.constant 0 : index
    %c113 = arith.constant 113 : index
    %22 = vector.load %arg5[%c0_21, %c113] : memref<4x512xf32, #tpu.memory_space<vmem>>, vector<4x256xf32>
    %cst_22 = arith.constant 0.000000e+00 : f32
    %23 = vector.broadcast %cst_22 : f32 to vector<4x256xf32>
    %24 = arith.select %8, %22, %23 : vector<4x256xi1>, vector<4x256xf32>
    %c8 = arith.constant 8 : index
    %c0_23 = arith.constant 0 : index
    %25 = vector.load %arg6[%c8, %c0_23] : memref<36x256xf32, #tpu.memory_space<vmem>>, vector<4x256xf32>
    tpu.vector_store %arg6[%c8, %c0_23], %24 {strides = array<i32>} : memref<36x256xf32, #tpu.memory_space<vmem>>, vector<4x256xf32>,
    %c0_24 = arith.constant 0 : index
    %c127 = arith.constant 127 : index
    %26 = vector.load %arg5[%c0_24, %c127] : memref<4x512xf32, #tpu.memory_space<vmem>>, vector<4x256xf32>
    %cst_25 = arith.constant 0.000000e+00 : f32
    %27 = vector.broadcast %cst_25 : f32 to vector<4x256xf32>
    %28 = arith.select %6, %26, %27 : vector<4x256xi1>, vector<4x256xf32>
    %c12 = arith.constant 12 : index
    %c0_26 = arith.constant 0 : index
    %29 = vector.load %arg6[%c12, %c0_26] : memref<36x256xf32, #tpu.memory_space<vmem>>, vector<4x256xf32>
    tpu.vector_store %arg6[%c12, %c0_26], %28 {strides = array<i32>} : memref<36x256xf32, #tpu.memory_space<vmem>>, vector<4x256xf32>,
    %c0_27 = arith.constant 0 : index
    %c128_28 = arith.constant 128 : index
    %30 = vector.load %arg5[%c0_27, %c128_28] : memref<4x512xf32, #tpu.memory_space<vmem>>, vector<4x256xf32>
    %c16 = arith.constant 16 : index
    %c0_29 = arith.constant 0 : index
    %31 = vector.load %arg6[%c16, %c0_29] : memref<36x256xf32, #tpu.memory_space<vmem>>, vector<4x256xf32>
    tpu.vector_store %arg6[%c16, %c0_29], %30 {strides = array<i32>} : memref<36x256xf32, #tpu.memory_space<vmem>>, vector<4x256xf32>,
    %c0_30 = arith.constant 0 : index
    %c129 = arith.constant 129 : index
    %32 = vector.load %arg5[%c0_30, %c129] : memref<4x512xf32, #tpu.memory_space<vmem>>, vector<4x256xf32>
    %cst_31 = arith.constant 0.000000e+00 : f32
    %33 = vector.broadcast %cst_31 : f32 to vector<4x256xf32>
    %34 = arith.select %8, %32, %33 : vector<4x256xi1>, vector<4x256xf32>
    %c20 = arith.constant 20 : index
    %c0_32 = arith.constant 0 : index
    %35 = vector.load %arg6[%c20, %c0_32] : memref<36x256xf32, #tpu.memory_space<vmem>>, vector<4x256xf32>
    tpu.vector_store %arg6[%c20, %c0_32], %34 {strides = array<i32>} : memref<36x256xf32, #tpu.memory_space<vmem>>, vector<4x256xf32>,
    %c0_33 = arith.constant 0 : index
    %c143 = arith.constant 143 : index
    %36 = vector.load %arg5[%c0_33, %c143] : memref<4x512xf32, #tpu.memory_space<vmem>>, vector<4x256xf32>
    %cst_34 = arith.constant 0.000000e+00 : f32
    %37 = vector.broadcast %cst_34 : f32 to vector<4x256xf32>
    %38 = arith.select %6, %36, %37 : vector<4x256xi1>, vector<4x256xf32>
    %c24 = arith.constant 24 : index
    %c0_35 = arith.constant 0 : index
    %39 = vector.load %arg6[%c24, %c0_35] : memref<36x256xf32, #tpu.memory_space<vmem>>, vector<4x256xf32>
    tpu.vector_store %arg6[%c24, %c0_35], %38 {strides = array<i32>} : memref<36x256xf32, #tpu.memory_space<vmem>>, vector<4x256xf32>,
    %c0_36 = arith.constant 0 : index
    %c144 = arith.constant 144 : index
    %40 = vector.load %arg5[%c0_36, %c144] : memref<4x512xf32, #tpu.memory_space<vmem>>, vector<4x256xf32>
    %c28 = arith.constant 28 : index
    %c0_37 = arith.constant 0 : index
    %41 = vector.load %arg6[%c28, %c0_37] : memref<36x256xf32, #tpu.memory_space<vmem>>, vector<4x256xf32>
    tpu.vector_store %arg6[%c28, %c0_37], %40 {strides = array<i32>} : memref<36x256xf32, #tpu.memory_space<vmem>>, vector<4x256xf32>,
    %c0_38 = arith.constant 0 : index
    %c145 = arith.constant 145 : index
    %42 = vector.load %arg5[%c0_38, %c145] : memref<4x512xf32, #tpu.memory_space<vmem>>, vector<4x256xf32>
    %cst_39 = arith.constant 0.000000e+00 : f32
    %43 = vector.broadcast %cst_39 : f32 to vector<4x256xf32>
    %44 = arith.select %8, %42, %43 : vector<4x256xi1>, vector<4x256xf32>
    %c32 = arith.constant 32 : index
    %c0_40 = arith.constant 0 : index
    %45 = vector.load %arg6[%c32, %c0_40] : memref<36x256xf32, #tpu.memory_space<vmem>>, vector<4x256xf32>
    tpu.vector_store %arg6[%c32, %c0_40], %44 {strides = array<i32>} : memref<36x256xf32, #tpu.memory_space<vmem>>, vector<4x256xf32>,
    %c0_41 = arith.constant 0 : index
    %c0_42 = arith.constant 0 : index
    %46 = vector.load %arg6[%c0_41, %c0_42] : memref<36x256xf32, #tpu.memory_space<vmem>>, vector<36x256xf32>
    %cst_43 = arith.constant dense<0.000000e+00> : vector<8x256xf32>
    %47 = tpu.matmul %11, %46, %cst_43 {dimension_numbers = #tpu.dot_dimension_numbers<[1], [0], [0], [1], [0, 0, 1, 1], [], []>} : vector<8x36xf32>, vector<36x256xf32>, vector<8x256xf32> -> vector<8x256xf32>
    %48 = vector.broadcast %12 : vector<8x1xf32> to vector<8x256xf32>
    %49 = arith.addf %47, %48 : vector<8x256xf32>
    %cst_44 = arith.constant 0.000000e+00 : f32
    %50 = vector.broadcast %cst_44 : f32 to vector<8x256xf32>
    %51 = arith.maximumf %49, %50 : vector<8x256xf32>
    %c0_45 = arith.constant 0 : index
    %c4_46 = arith.constant 4 : index
    %c0_47 = arith.constant 0 : index
    %52 = vector.load %arg4[%c0_45, %c4_46, %c0_47] : memref<1x12x256xf32, #tpu.memory_space<vmem>>, vector<1x8x256xf32>
    %53 = vector.shape_cast %52 : vector<1x8x256xf32> to vector<8x256xf32>
    %54 = vector.shape_cast %51 : vector<8x256xf32> to vector<1x8x256xf32>
    tpu.vector_store %arg4[%c0_45, %c4_46, %c0_47], %54 {strides = array<i32>} : memref<1x12x256xf32, #tpu.memory_space<vmem>>, vector<1x8x256xf32>,
    return
  }
  func.func @transform_0(%arg0: i32) -> (i32, i32, i32) {
    %c0_i32 = arith.constant 0 : i32
    %c0_i32_0 = arith.constant 0 : i32
    %c0_i32_1 = arith.constant 0 : i32
    return %arg0, %c0_i32, %c0_i32_0 : i32, i32, i32
  }
  func.func @transform_1(%arg0: i32) -> (i32, i32) {
    %c0_i32 = arith.constant 0 : i32
    %c0_i32_0 = arith.constant 0 : i32
    %c0_i32_1 = arith.constant 0 : i32
    return %c0_i32, %c0_i32_0 : i32, i32
  }
  func.func @transform_2(%arg0: i32) -> (i32, i32) {
    %c0_i32 = arith.constant 0 : i32
    %c0_i32_0 = arith.constant 0 : i32
    %c0_i32_1 = arith.constant 0 : i32
    return %c0_i32, %c0_i32_0 : i32, i32
  }
  func.func @transform_3(%arg0: i32) -> (i32, i32, i32) {
    %c0_i32 = arith.constant 0 : i32
    %c0_i32_0 = arith.constant 0 : i32
    %c0_i32_1 = arith.constant 0 : i32
    return %arg0, %c0_i32, %c0_i32_0 : i32, i32, i32
  }
}

</mosaic_0001>

<bundles_post_ra>
// kernel: dense_layer.1
= control target key start
LH: loop header
LB: loop body
LE: loop exit
PB: predicated region body
PF: predicated region fallthrough
CT: control target
= control target key end

     0   :  { %s621_s12 = smov 0   ;;  %s727_s0 = inlined_call_operand.vmem [shape: f32[2,4,256], index: 0, kind: input, shape index: {}]   ;;  %s728_s1 = inlined_call_operand.vmem [shape: f32[8,36], index: 1, kind: input, shape index: {}]   ;;  %s729_s2 = inlined_call_operand.vmem [shape: f32[8,1], index: 2, kind: input, shape index: {}]   ;;  %s730_s3 = inlined_call_operand.vmem [shape: f32[2,12,256], index: 3, kind: output, shape index: {}]  }
   0x1 LB: > { %s547_s13 = sadd.s32 4294967295, %s589_s12   ;;  %p551_p0 = scmp.ge.s32.totalorder %s589_s12, 1  ;;  %s589_s12 = sphi %s621_s12, %s13_s12  }
   0x2   : > { %p137_p1 = scmp.lt.s32.totalorder %s589_s12, 3 }
   0x4   : > { %p138_p2 = pnand %p551_p0, %p137_p1 }
   0x5   : > { %p161_p3 = scmp.lt.s32.totalorder (!%p138_p2), %s547_s13, 1  ;;  %s592_s18 = smov (!%p138_p2), 15  }
   0x6   : > { %141 = sbr.rel (%p138_p2) target bundleno = 381 (0x17d), region = 32  ;;  %s593_s19 = smov (!%p138_p2), 1  }
   0x7   : > { %s594_s20 = smov (!%p138_p2), 127   ;;  %s595_s21 = smov (!%p138_p2), 113  }
   0x8   : > { %s596_s22 = smov (!%p138_p2), 112   ;;  %s597_s23 = smov (!%p138_p2), 111  }
   0x9   : > { %s598_s24 = smov (!%p138_p2), 17   ;;  %s599_s25 = smov (!%p138_p2), 16  }
   0xb   : > { %v591_v0 = vmov 0.0   ;;  %s740_s13 = smov (!%p161_p3, %s547_s13), 1  ;;  %v180_v40 = vlaneseq  ;;  %vm260_vm0 = vcmask 121856   ;;  %vm325_vm3 = vcmask 1039360  }
   0xc   : > { %189 = vst [vmem:[#allocation2] sm:$0xff] %v591_v0  ;;  %s562_s14 = sshll.u32 %s740_s13, 3  ;;  %vm285_vm4 = vcmask 7168   ;;  %vm356_vm7 = vcmask 924672   ;;  %vm382_vm8 = vcmask 916480   ;;  %vm405_vm9 = vcmask 908288  }
   0xd   : > { %190 = vst [vmem:[#allocation2 + $0x8] sm:$0xff] %v591_v0  ;;  %s165_s17 = scalar_lea.vmem %s727_s0, %s562_s14  ;;  %v181_v42 = vand.u32 127, %v180_v40  ;;  %vm211_vm10 = vcmask 138240   ;;  %vm237_vm11 = vcmask 130048   ;;  %vm433_vm12 = vcmask 1043456   ;;  %s563_s30 = sshll.u32 %s740_s13, 5 }
   0xe   : > { %v635_v1 = vld [vmem:[%s165_s17] sm:$0xff]  ;;  %vm429_vm13 = vcmask 293888   ;;  %s170_s6 = scalar_lea.vmem %s730_s3, %s563_s30 }
   0xf   : > { %173 = vst [vmem:[#allocation1] ss:$2 sm:$0xff] %v635_v1  ;;  %v182_v43 = vadd.s32 128, %v181_v42  ;;  %v183_v46 = vand.u32 15, %v181_v42 }
  0x10   : > { %194 = vst [vmem:[#allocation2 + $0x4] sm:$0xff] %v635_v1 }
  0x11   : > { %v184_v45 = vand.u32 15, %v182_v43  ;;  %vm670_vm2 = vcmp.le.s32.totalorder %v183_v46, 14  ;;  %vm685_vm6 = vcmp.ge.s32.totalorder %v183_v46, 1 }
  0x13   : > { %vm666_vm1 = vcmp.le.s32.totalorder %v184_v45, 14  ;;  %vm681_vm5 = vcmp.ge.s32.totalorder %v184_v45, 1 }
  0x14   : > { %v310_v18 = vld [vmem:[#allocation2 + $0xc] sm:$0xf] }
  0x15   : > { %v341_v22 = vld [vmem:[#allocation2 + $0xc] sm:$0xf] }
  0x16   : > { %v639_v2 = vld.sshfl [vmem:[#allocation1] sm:$0xff pattern:$0x75316420]  ;;  %v641_v3 = vld.sshfl [vmem:[#allocation1 + $0x8] sm:$0xff pattern:$0x75316420] }
  0x17   : > { %v195_v4 = vld [vmem:[#allocation2] sm:$0xff]  ;;  %v196_v5 = vld [vmem:[#allocation2 + $0x8] sm:$0xf]  ;;  %v366_v26 = vld [vmem:[#allocation2 + $0xc] sm:$0xf]  ;;  %178 = vst [vmem:[%s170_s6] sm:$0xf] %v639_v2 }
  0x18   : > { %199 = vst [vmem:[#allocation1] ss:$2 sm:$0xff] %v195_v4  ;;  %v221_v6 = vld [vmem:[#allocation2 + $0x8] sm:$0xf]  ;;  %v390_v30 = vld [vmem:[#allocation2 + $0xc] sm:$0xf] }
  0x19   : > { %201 = vst [vmem:[#allocation1 + $0x10] ss:$2 sm:$0xff] %v196_v5  ;;  %v245_v10 = vld [vmem:[#allocation2 + $0x8] sm:$0xf] }
  0x1a   : > { %v270_v14 = vld [vmem:[#allocation2 + $0x8] sm:$0xf]  ;;  %179 = vst [vmem:[%s170_s6 + $0x8] sm:$0xf] %v641_v3 }
  0x1f   : > { %v643_v7 = vld.sshfl [vmem:[#allocation1] sm:$0xff pattern:$0x75316420]  ;;  %v645_v8 = vld.sshfl [vmem:[#allocation1 + $0x8] sm:$0xff pattern:$0x75316420] }
  0x20   : > { %225 = vst [vmem:[#allocation1 + $0x1] ss:$2 sm:$0xff] %v195_v4  ;;  %v647_v9 = vld.sshfl [vmem:[#allocation1 + $0x10] sm:$0xff pattern:$0x75316420] }
  0x21   : > { %227 = vst [vmem:[#allocation1 + $0x11] ss:$2 sm:$0xff] %v221_v6 }
  0x27   : > { %v649_v11 = vld.sshfl [vmem:[#allocation1] sm:$0xff pattern:$0x75316420]  ;;  %v651_v12 = vld.sshfl [vmem:[#allocation1 + $0x8] sm:$0xff pattern:$0x75316420] }
  0x28   : > { %248 = vst [vmem:[#allocation1] ss:$2 sm:$0xff] %v195_v4  ;;  %v653_v13 = vld.sshfl [vmem:[#allocation1 + $0x10] sm:$0xff pattern:$0x75316420] }
  0x29   : > { %250 = vst [vmem:[#allocation1 + $0x10] ss:$2 sm:$0xff] %v245_v10 }
  0x2f   : > { %v252_v15 = vld.sshfl [vmem:[#allocation1 + $0x8] sm:$0xff pattern:$0x75316420]  ;;  %v251_v16 = vld.sshfl [vmem:[#allocation1] sm:$0xff pattern:$0x75316420] }
  0x30   : > { %256 = vrot.lane.b32.xlu1 %v252_v15, %s592_s18  ;;  %254 = vrot.lane.b32.xlu0 %v251_v16, %s592_s18  ;;  %273 = vst [vmem:[#allocation1] ss:$2 sm:$0xff] %v195_v4  ;;  %v253_v17 = vld.sshfl [vmem:[#allocation1 + $0x10] sm:$0xff pattern:$0x75316420] }
  0x31   : > { %258 = vrot.lane.b32.xlu2 %v253_v17, %s592_s18  ;;  %275 = vst [vmem:[#allocation1 + $0x10] ss:$2 sm:$0xff] %v270_v14 }
  0x37   : > { %v277_v19 = vld.sshfl [vmem:[#allocation1 + $0x8] sm:$0xff pattern:$0x75316420]  ;;  %v276_v20 = vld.sshfl [vmem:[#allocation1] sm:$0xff pattern:$0x75316420] }
  0x38   : > { %281 = vrot.lane.b32.xlu1 %v277_v19, %s593_s19  ;;  %279 = vrot.lane.b32.xlu0 %v276_v20, %s593_s19  ;;  %302 = vst [vmem:[#allocation1] ss:$2 sm:$0xff] %v635_v1  ;;  %v278_v21 = vld.sshfl [vmem:[#allocation1 + $0x10] sm:$0xff pattern:$0x75316420] }
  0x39   : > { %283 = vrot.lane.b32.xlu2 %v278_v21, %s593_s19  ;;  %315 = vst [vmem:[#allocation1 + $0x10] ss:$2 sm:$0xff] %v310_v18 }
  0x3f   : > { %v303_v23 = vld.sshfl [vmem:[#allocation1] sm:$0xff pattern:$0x75316420]  ;;  %v304_v24 = vld.sshfl [vmem:[#allocation1 + $0x8] sm:$0xff pattern:$0x75316420] }
  0x40   : > { %307 = vst [vmem:[#allocation3 + $0x48] sm:$0xf] %v303_v23  ;;  %v318_v25 = vld.sshfl [vmem:[#allocation1 + $0x10] sm:$0xff pattern:$0x75316420] }
  0x41   : > { %308 = vst [vmem:[#allocation3 + $0x28] sm:$0xf] %v304_v24  ;;  %323 = vrot.lane.b32.xlu2 %v318_v25, %s594_s20  ;;  %v192_v25 = vld [vmem:[%s729_s2] sm:$0xff] }
  0x42   : > { %313 = vst [vmem:[#allocation1] ss:$2 sm:$0xff] %v635_v1 }
  0x43   : > { %346 = vst [vmem:[#allocation1 + $0x10] ss:$2 sm:$0xff] %v341_v22 }
  0x49   : > { %v316_v27 = vld.sshfl [vmem:[#allocation1] sm:$0xff pattern:$0x75316420]  ;;  %v317_v28 = vld.sshfl [vmem:[#allocation1 + $0x8] sm:$0xff pattern:$0x75316420] }
  0x4a   : > { %319 = vrot.lane.b32.xlu1 %v316_v27, %s594_s20  ;;  %344 = vst [vmem:[#allocation1] ss:$2 sm:$0xff] %v635_v1  ;;  %v349_v29 = vld.sshfl [vmem:[#allocation1 + $0x10] sm:$0xff pattern:$0x75316420]  ;;  %321 = vrot.lane.b32.xlu2 %v317_v28, %s594_s20 }
  0x4b   : > { %372 = vst [vmem:[#allocation1 + $0x11] ss:$2 sm:$0xff] %v366_v26  ;;  %v600_v26 = vmov 0  }
  0x4c   : > { %582 = vset.pattern.permute.xlu0 %v600_v26 }
  0x51   : > { %v348_v31 = vld.sshfl [vmem:[#allocation1 + $0x8] sm:$0xff pattern:$0x75316420]  ;;  %v347_v32 = vld.sshfl [vmem:[#allocation1] sm:$0xff pattern:$0x75316420] }
  0x52   : > { %352 = vrot.lane.b32.xlu1 %v348_v31, %s595_s21  ;;  %350 = vrot.lane.b32.xlu0 %v347_v32, %s595_s21  ;;  %370 = vst [vmem:[#allocation1 + $0x1] ss:$2 sm:$0xff] %v635_v1  ;;  %v375_v33 = vld.sshfl [vmem:[#allocation1 + $0x10] sm:$0xff pattern:$0x75316420] }
  0x53   : > { %395 = vst [vmem:[#allocation1 + $0x10] ss:$2 sm:$0xff] %v390_v30  ;;  %354 = vrot.lane.b32.xlu2 %v349_v29, %s595_s21 }
  0x59   : > { %v373_v34 = vld.sshfl [vmem:[#allocation1] sm:$0xff pattern:$0x75316420]  ;;  %v374_v35 = vld.sshfl [vmem:[#allocation1 + $0x8] sm:$0xff pattern:$0x75316420] }
  0x5a   : > { %v398_v36 = vld.sshfl [vmem:[#allocation1 + $0x10] sm:$0xff pattern:$0x75316420]  ;;  %376 = vrot.lane.b32.xlu0 %v373_v34, %s596_s22  ;;  %393 = vst [vmem:[#allocation1] ss:$2 sm:$0xff] %v635_v1 }
  0x5b   : > { %403 = vrot.lane.b32.xlu1 %v398_v36, %s597_s23  ;;  %380 = vrot.lane.b32.xlu2 %v375_v33, %s596_s22 }
  0x61   : > { %v396_v37 = vld.sshfl [vmem:[#allocation1] sm:$0xff pattern:$0x75316420]  ;;  %v397_v38 = vld.sshfl [vmem:[#allocation1 + $0x8] sm:$0xff pattern:$0x75316420] }
  0x62   : > { %399 = vrot.lane.b32.xlu0 %v396_v37, %s597_s23 }
  0x63   : > { %378 = vrot.lane.b32.xlu1 %v374_v35, %s596_s22  ;;  %209 = vrot.lane.b32.xlu2 %v647_v9, %s598_s24 }
  0x6a   : > { %401 = vrot.lane.b32.xlu0 %v397_v38, %s597_s23 }
  0x6b   : > { %207 = vrot.lane.b32.xlu1 %v645_v8, %s598_s24  ;;  %235 = vrot.lane.b32.xlu2 %v653_v13, %s599_s25 }
  0x72   : > { %205 = vrot.lane.b32.xlu0 %v643_v7, %s598_s24 }
  0x73   : > { %233 = vrot.lane.b32.xlu1 %v651_v12, %s599_s25 }
  0x7a   : > { %231 = vrot.lane.b32.xlu0 %v649_v11, %s599_s25 }
  0x82   : > { %426 = vperm.xlu0 %582, %v192_v25  }
  0x8b   : > { %v259_v39 = vpop.permute.xlu2 %258 }
  0x93   : > { %v284_v41 = vpop.permute.xlu2 %283 }
  0x9b   : > { %v324_v44 = vpop.permute.xlu2 %323 }
  0xa2   : > { %v257_v49 = vpop.permute.xlu1 %256  ;;  %v255_v50 = vpop.permute.xlu0 %254 }
  0xa3   : > { %v262_v51 = vsel %vm260_vm0, %v257_v49, %v259_v39  ;;  %v261_v52 = vsel %vm260_vm0, %v255_v50, %v257_v49 }
  0xa4   : > { %v266_v53 = vsel %vm666_vm1, %v262_v51, 0.0  ;;  %v265_v54 = vsel %vm670_vm2, %v261_v52, 0.0  ;;  %v322_v55 = vpop.permute.xlu2 %321  ;;  %v191_v52 = vld [vmem:[%s728_s1] sm:$0xff] }
  0xa5   : > { %268 = vst [vmem:[#allocation3 + $0x10] sm:$0xf] %v266_v53  ;;  %v327_v56 = vsel %vm325_vm3, %v322_v55, %v324_v44 }
  0xa6   : > { %267 = vst [vmem:[#allocation3 + $0x18] sm:$0xf] %v265_v54  ;;  %v331_v57 = vsel %vm666_vm1, %v327_v56, 0.0 }
  0xa7   : > { %v335_v58 = vrot.slane %v331_v57, 4 }
  0xa9   : > { %339 = vst [vmem:[#allocation3 + $0x28] sm:$0xf0] %v335_v58 }
  0xaa   : > { %v282_v61 = vpop.permute.xlu1 %281  ;;  %v280_v62 = vpop.permute.xlu0 %279 }
  0xab   : > { %v287_v63 = vsel %vm285_vm4, %v282_v61, %v284_v41  ;;  %v286_v0 = vsel %vm285_vm4, %v280_v62, %v282_v61 }
  0xac   : > { %v291_v1 = vsel %vm681_vm5, %v287_v63, 0.0  ;;  %v290_v4 = vsel %vm685_vm6, %v286_v0, 0.0 }
  0xad   : > { %v295_v5 = vrot.slane %v291_v1, 4  ;;  %v294_v6 = vrot.slane %v290_v4, 4  ;;  %v355_v11 = vpop.permute.xlu2 %354 }
  0xaf   : > { %299 = vst [vmem:[#allocation3 + $0x10] sm:$0xf0] %v295_v5 }
  0xb0   : > { %298 = vst [vmem:[#allocation3 + $0x18] sm:$0xf0] %v294_v6  ;;  %v419_v47 = vld [vmem:[#allocation3 + $0x28] sm:$0xff] }
  0xb5   : > { %v381_v20 = vpop.permute.xlu2 %380 }
  0xb6   : > { %v417_v51 = vld [vmem:[#allocation3 + $0x10] sm:$0xff] }
  0xb7   : > { %v416_v49 = vld [vmem:[#allocation3 + $0x18] sm:$0xff] }
  0xbc   : > { %v320_v7 = vpop.permute.xlu1 %319 }
  0xbd   : > { %v326_v8 = vsel %vm325_vm3, %v320_v7, %v322_v55  ;;  %v210_v27 = vpop.permute.xlu2 %209 }
  0xbe   : > { %v330_v9 = vsel %vm670_vm2, %v326_v8, 0.0 }
  0xbf   : > { %v334_v10 = vrot.slane %v330_v9, 4 }
  0xc1   : > { %338 = vst [vmem:[#allocation3 + $0x48] sm:$0xf0] %v334_v10 }
  0xc4   : > { %v353_v12 = vpop.permute.xlu1 %352  ;;  %v351_v13 = vpop.permute.xlu0 %350 }
  0xc5   : > { %v357_v14 = vsel %vm356_vm7, %v351_v13, %v353_v12  ;;  %v358_v15 = vsel %vm356_vm7, %v353_v12, %v355_v11  ;;  %v236_v36 = vpop.permute.xlu2 %235 }
  0xc6   : > { %v361_v16 = vsel %vm685_vm6, %v357_v14, 0.0  ;;  %v362_v17 = vsel %vm681_vm5, %v358_v15, 0.0 }
  0xc7   : > { %363 = vst [vmem:[#allocation3 + $0x8] sm:$0xf] %v361_v16 }
  0xc8   : > { %364 = vst [vmem:[#allocation3 + $0x20] sm:$0xf] %v362_v17  ;;  %v418_v46 = vld [vmem:[#allocation3 + $0x48] sm:$0xff] }
  0xcc   : > { %v377_v18 = vpop.permute.xlu0 %376 }
  0xcd   : > { %v404_v19 = vpop.permute.xlu1 %403 }
  0xd4   : > { %v400_v21 = vpop.permute.xlu0 %399 }
  0xd5   : > { %v379_v22 = vpop.permute.xlu1 %378 }
  0xd6   : > { %v383_v23 = vsel %vm382_vm8, %v377_v18, %v379_v22  ;;  %v384_v24 = vsel %vm382_vm8, %v379_v22, %v381_v20 }
  0xd7   : > { %387 = vst [vmem:[#allocation3 + $0x8] sm:$0xf0] %v383_v23 }
  0xd8   : > { %388 = vst [vmem:[#allocation3 + $0x20] sm:$0xf0] %v384_v24 }
  0xdc   : > { %v402_v28 = vpop.permute.xlu0 %401 }
  0xdd   : > { %v406_v29 = vsel %vm405_vm9, %v400_v21, %v402_v28  ;;  %v407_v30 = vsel %vm405_vm9, %v402_v28, %v404_v19  ;;  %v208_v31 = vpop.permute.xlu1 %207 }
  0xde   : > { %v410_v32 = vsel %vm670_vm2, %v406_v29, 0.0  ;;  %v411_v33 = vsel %vm666_vm1, %v407_v30, 0.0  ;;  %v213_v34 = vsel %vm211_vm10, %v208_v31, %v210_v27  ;;  %v420_v44 = vld [vmem:[#allocation3 + $0x8] sm:$0xff] }
  0xdf   : > { %412 = vst [vmem:[#allocation3 + $0x40] sm:$0xf] %v410_v32  ;;  %v217_v35 = vsel %vm681_vm5, %v213_v34, 0.0  ;;  %v421_v45 = vld [vmem:[#allocation3 + $0x20] sm:$0xff] }
  0xe0   : > { %413 = vst [vmem:[#allocation3 + $0x38] sm:$0xf] %v411_v33 }
  0xe1   : > { %219 = vst [vmem:[#allocation3] sm:$0xf] %v217_v35 }
  0xe4   : > { %v206_v37 = vpop.permute.xlu0 %205 }
  0xe5   : > { %v212_v38 = vsel %vm211_vm10, %v206_v37, %v208_v31  ;;  %v234_v39 = vpop.permute.xlu1 %233 }
  0xe6   : > { %v216_v40 = vsel %vm685_vm6, %v212_v38, 0.0  ;;  %v239_v41 = vsel %vm237_vm11, %v234_v39, %v236_v36  ;;  %v422_v42 = vld [vmem:[#allocation3 + $0x40] sm:$0xf] }
  0xe7   : > { %218 = vst [vmem:[#allocation3 + $0x30] sm:$0xf] %v216_v40  ;;  %556 = vmatpush.msk.msra.mxu0 %vm433_vm12, %v422_v42  ;;  %v423_v43 = vld [vmem:[#allocation3 + $0x38] sm:$0xf] }
  0xe8   : > { %243 = vst [vmem:[#allocation3] sm:$0xf0] %v239_v41  ;;  %558 = vmatpush.msk.msra.mxu1 %vm433_vm12, %v423_v43 }
  0xe9   : > { %452 = vmatpush.msra.mxu0 %v420_v44 }
  0xea   : > { %472 = vmatpush.msra.mxu1 %v421_v45 }
  0xeb   : > { %453 = vmatpush.msra.mxu0 %v418_v46 }
  0xec   : > { %473 = vmatpush.msra.mxu1 %v419_v47  ;;  %v232_v48 = vpop.permute.xlu0 %231 }
  0xed   : > { %v238_v50 = vsel %vm237_vm11, %v232_v48, %v234_v39  ;;  %454 = vmatpush.msra.mxu0 %v416_v49 }
  0xee   : > { %242 = vst [vmem:[#allocation3 + $0x30] sm:$0xf0] %v238_v50  ;;  %474 = vmatpush.msra.mxu1 %v417_v51 }
  0xef   : > { %v415_v53 = vld [vmem:[#allocation3] sm:$0xff] }
  0xf0   : > { %475 = vmatpush.msra.mxu1 %v415_v53 }
  0xf1   : > { %559 = vmatmul.msk.f32.vlgmr.msra.gmra.mxu1 %vm429_vm13, %v191_v52 }
  0xf4   : > { %v427_v55 = vpop.permute.xlu0 %426 }
  0xf5   : > { %v414_v54 = vld [vmem:[#allocation3 + $0x30] sm:$0xff] }
  0xf6   : > { %455 = vmatpush.msra.mxu0 %v414_v54 }
  0xf7   : > { %557 = vmatmul.msk.f32.vlgmr.msra.gmra.mxu0 %vm429_vm13, %v191_v52 }
 0x16e   : > { %v477_v56 = vpop.f32.mrf.mxu1 }
 0x16f   : > { %v478_v57 = vadd.f32 %v477_v56, %v427_v55 }
 0x171   : > { %v481_v58 = vmax.f32 %v478_v57, 0.0 }
 0x173   : > { %v485_v59 = vrot.slane %v481_v58, 4 }
 0x174   : > { %v457_v60 = vpop.f32.mrf.mxu0 }
 0x175   : > { %489 = vst [vmem:[%s170_s6 + $0x8] sm:$0xf0] %v485_v59  ;;  %v458_v61 = vadd.f32 %v457_v60, %v427_v55 }
 0x176   : > { %491 = vst [vmem:[%s170_s6 + $0x18] sm:$0xf] %v485_v59 }
 0x177   : > { %v480_v62 = vmax.f32 %v458_v61, 0.0 }
 0x179   : > { %v484_v63 = vrot.slane %v480_v62, 4 }
 0x17b   : > { %488 = vst [vmem:[%s170_s6] sm:$0xf0] %v484_v63 }
 0x17c   : > { %490 = vst [vmem:[%s170_s6 + $0x10] sm:$0xf] %v484_v63 }
 0x17d PF: > { %s13_s12 = sadd.s32 1, %s589_s12  }
 0x17e   : > { %p10_p4 = scmp.ge.s32.totalorder %s13_s12, 4  }
 0x180   :  { %12 = sbr.rel (!%p10_p4) target bundleno = 1 (0x1), region = 72 }

</bundles_post_ra>
